<compile_context>
chip_gen: v5e
topology: v5e:2x2
jax: 0.10.0
libtpu: 0.0.40
codegen_flags: <defaults>
</compile_context>

<pallas_src>
import numpy as np
import jax
import jax.numpy as jnp
from jax.experimental import pallas as pl
from jax.experimental.pallas import tpu as pltpu

N_QUBITS = 4
N_LAYERS = 3
IN_FEATURES = 512
BATCH = 8
DIM = 2 ** N_QUBITS        # statevector dimension


# ----------------------------------------------------------------------------
# Host-side (glue): input-independent circuit unitary, Z table, bit table
# ----------------------------------------------------------------------------
def _ry_mat(theta):
    c, s = np.cos(theta / 2.0), np.sin(theta / 2.0)
    return np.array([[c, -s], [s, c]], dtype=np.float64)


def _cnot_mat(n, control, target):
    dim = 2 ** n
    m = np.zeros((dim, dim), dtype=np.float64)
    for b in range(dim):
        cbit = (b >> (n - 1 - control)) & 1
        out = b ^ (1 << (n - 1 - target)) if cbit else b
        m[out, b] = 1.0
    return m


def build_circuit_unitary(weights, n_qubits):
    """U_w s.t. |psi_final> = U_w |psi0>. PennyLane convention: wire 0 = most-significant bit."""
    dim = 2 ** n_qubits
    U = np.eye(dim, dtype=np.float64)
    for layer in range(weights.shape[0]):
        r_all = np.array([[1.0]])
        for q in range(n_qubits):
            r_all = np.kron(r_all, _ry_mat(weights[layer, q]))
        layer_u = r_all
        for q in range(n_qubits - 1):
            layer_u = _cnot_mat(n_qubits, q, q + 1) @ layer_u
        U = layer_u @ U
    return U.astype(np.float32)


def build_z_table(n_qubits):
    """Z[b, q] = +1 if bit of wire q in basis state b is 0, else -1."""
    dim = 2 ** n_qubits
    z = np.empty((dim, n_qubits), dtype=np.float32)
    for b in range(dim):
        for q in range(n_qubits):
            bit = (b >> (n_qubits - 1 - q)) & 1
            z[b, q] = 1.0 if bit == 0 else -1.0
    return z


def build_bit0_table(n_qubits):
    """bit0[q, b] = 1.0 if bit of wire q in basis state b is 0 else 0.0."""
    dim = 2 ** n_qubits
    bit0 = np.empty((n_qubits, dim), dtype=np.float32)
    for q in range(n_qubits):
        for b in range(dim):
            bit = (b >> (n_qubits - 1 - q)) & 1
            bit0[q, b] = 1.0 if bit == 0 else 0.0
    return bit0


# ----------------------------------------------------------------------------
# Pallas kernel: full forward pass for one (TB, 512) batch tile
# ----------------------------------------------------------------------------
def dressed_qc_kernel(x_ref, wphi_ref, bphi_ref, u_t_ref, bit0_ref, zw_ref, bpost_ref, out_ref):
    # pre_net fused with the phi affine, only n_qubits output columns:
    #   phi = x @ (Wpre^T * pi/4) + (bpre * pi/4 + pi/4)
    phi = jnp.dot(x_ref[...], wphi_ref[...],
                  preferred_element_type=jnp.float32) + bphi_ref[...]

    # single-qubit state after H then RY(theta): [cos(phi), sin(phi)]  -- (TB, nq) only
    c = jnp.cos(phi)   # amplitude for bit == 0
    s = jnp.sin(phi)   # amplitude for bit == 1
    d = c - s          # amp = s + bit0 * (c - s)

    nq = bit0_ref.shape[0]

    # product statevector psi0: (TB, 2^nq), initialised from qubit 0 (no ones/bit1 table)
    psi0 = s[:, 0:1] + d[:, 0:1] * bit0_ref[0:1, :]
    for q in range(1, nq):  # tiny static loop over qubits
        psi0 = psi0 * (s[:, q:q + 1] + d[:, q:q + 1] * bit0_ref[q:q + 1, :])

    # apply layered circuit unitary: psi = psi0 @ U^T
    psi = jnp.dot(psi0, u_t_ref[...], preferred_element_type=jnp.float32)

    # PauliZ expectations folded with post_net weight:
    #   logits = (psi^2) @ (Z @ Wpost^T) + bpost  == sum_b (psi^2 * zw_row) + bpost
    probs = psi * psi
    logits = jnp.sum(probs * zw_ref[...], axis=1, keepdims=True) + bpost_ref[...]
    out_ref[...] = jax.nn.sigmoid(logits)
    # TODO(synk): carry the quantum tail in (dim, TB) layout (transpose of the (TB, nq) phi slab)
    # for a fully lane-dense U matmul and an unmasked (1, TB) output store, once the narrow 2-D
    # transpose lowering is validated on all target generations.


def _choose_batch_tile(B, block_b):
    """Pick (tb, b_pad): big tiles, and >= 2 grid steps for moderate/large B (v7x megacore)."""
    b8 = -(-B // 8) * 8
    if b8 <= 256:
        return b8, b8                                  # single grid step; blocks == full array dims
    half = -(-b8 // 256) * 128                         # ~b8/2 rounded up to a 128 multiple
    tb = max(128, min((block_b // 128) * 128, half))   # multiple of 128 -> >= 2 steps
    b_pad = -(-b8 // tb) * tb
    return tb, b_pad


def dressed_quantum_circuit(x, wpre, bpre, wpost, bpost, weights, *,
                            block_b=1024, pre_dtype=jnp.float32):
    """x: (B, 512) f32. Returns sigmoid(post_net(quantum(pre_net(x)))) of shape (B, 1)."""
    B, F = x.shape
    n_qubits = wpre.shape[0]
    dim = 2 ** n_qubits

    # ---- host-side constant prep (depends only on parameters) ----
    u = build_circuit_unitary(np.asarray(weights), n_qubits)                    # (dim, dim)
    z = build_z_table(n_qubits)                                                 # (dim, nq)
    bit0 = build_bit0_table(n_qubits)                                           # (nq, dim)

    # fold phi = y*pi/4 + pi/4 into pre_net weights (only nq columns -> 32x less EUP work)
    wphi = (np.asarray(wpre, np.float64).T * (np.pi / 4.0)).astype(np.float32)  # (F, nq)
    bphi = (np.asarray(bpre, np.float64) * (np.pi / 4.0) + (np.pi / 4.0)) \
        .astype(np.float32).reshape(1, n_qubits)

    # fold Z table into post_net weight as a (1, dim) row for the lane reduction
    zw_row = (np.asarray(wpost, np.float64) @ z.astype(np.float64).T).astype(np.float32)  # (1, dim)
    bpost_2d = np.asarray(bpost, np.float32).reshape(1, 1)
    u_t = np.ascontiguousarray(u.T)                                             # (dim, dim)

    # ---- batch tiling ----
    tb, b_pad = _choose_batch_tile(B, block_b)
    x_in = jnp.asarray(x, jnp.float32)
    if b_pad != B:
        x_in = jnp.pad(x_in, ((0, b_pad - B), (0, 0)))
    x_in = x_in.astype(pre_dtype)
    wphi_dev = jnp.asarray(wphi).astype(pre_dtype)
    grid = (b_pad // tb,)

    itemsize = jnp.dtype(pre_dtype).itemsize
    cost = pl.CostEstimate(
        flops=int(2 * b_pad * F * n_qubits + 2 * b_pad * dim * dim
                  + 3 * b_pad * dim * n_qubits + 2 * b_pad * dim),
        transcendentals=int(b_pad * (2 * n_qubits + 1)),
        bytes_accessed=int(b_pad * F * itemsize + b_pad * 4 + F * n_qubits * itemsize
                           + (dim * dim + n_qubits * dim + dim + n_qubits + 2) * 4),
    )

    out = pl.pallas_call(
        dressed_qc_kernel,
        out_shape=jax.ShapeDtypeStruct((b_pad, 1), jnp.float32),
        grid_spec=pltpu.PrefetchScalarGridSpec(
            num_scalar_prefetch=0,
            grid=grid,
            in_specs=[
                pl.BlockSpec((tb, F), lambda i: (i, 0)),          # x tile: pipelined/double-buffered
                pl.BlockSpec((F, n_qubits), lambda i: (0, 0)),    # fused pre_net weight (512, nq)
                pl.BlockSpec((1, n_qubits), lambda i: (0, 0)),    # fused pre_net bias
                pl.BlockSpec((dim, dim), lambda i: (0, 0)),       # U^T
                pl.BlockSpec((n_qubits, dim), lambda i: (0, 0)),  # bit0 table
                pl.BlockSpec((1, dim), lambda i: (0, 0)),         # Wpost @ Z^T row
                pl.BlockSpec((1, 1), lambda i: (0, 0)),           # post_net bias
            ],
            out_specs=pl.BlockSpec((tb, 1), lambda i: (i, 0)),
        ),
        compiler_params=pltpu.CompilerParams(
            dimension_semantics=("parallel",)),
        cost_estimate=cost,
    )(x_in, wphi_dev, jnp.asarray(bphi), jnp.asarray(u_t),
      jnp.asarray(bit0), jnp.asarray(zw_row), jnp.asarray(bpost_2d))
    return out[:B]


# ----------------------------------------------------------------------------
# Pure-numpy reference (same math, f64) for a sanity check
# ----------------------------------------------------------------------------
def reference_forward(x, wpre, bpre, wpost, bpost, weights):
    x = np.asarray(x, dtype=np.float64)
    n_qubits = wpre.shape[0]
    u = build_circuit_unitary(np.asarray(weights), n_qubits).astype(np.float64)
    z = build_z_table(n_qubits).astype(np.float64)
    y = x @ np.asarray(wpre, np.float64).T + np.asarray(bpre, np.float64)
    phi = y * (np.pi / 4.0) + (np.pi / 4.0)
    c, s = np.cos(phi), np.sin(phi)
    dim = 2 ** n_qubits
    psi0 = np.ones((x.shape[0], dim))
    for q in range(n_qubits):
        bit = (np.arange(dim)[None, :] >> (n_qubits - 1 - q)) & 1
        psi0 = psi0 * np.where(bit == 0, c[:, q:q + 1], s[:, q:q + 1])
    psi = psi0 @ u.T
    q_out = (psi ** 2) @ z
    logits = q_out @ np.asarray(wpost, np.float64).T + np.asarray(bpost, np.float64)
    return 1.0 / (1.0 + np.exp(-logits))


if __name__ == "__main__":
    key = jax.random.PRNGKey(0)
    k_x, k_wpre, k_bpre, k_wpost, k_bpost, k_w, k_x2 = jax.random.split(key, 7)

    x = jax.random.normal(k_x, (BATCH, IN_FEATURES), dtype=jnp.float32)
    # nn.Linear(512, n_qubits): weight (nq, 512), bias (nq,)
    wpre = jax.random.normal(k_wpre, (N_QUBITS, IN_FEATURES), dtype=jnp.float32) * 0.05
    bpre = jax.random.normal(k_bpre, (N_QUBITS,), dtype=jnp.float32) * 0.05
    # nn.Linear(n_qubits, 1): weight (1, nq), bias (1,)
    wpost = jax.random.normal(k_wpost, (1, N_QUBITS), dtype=jnp.float32) * 0.5
    bpost = jax.random.normal(k_bpost, (1,), dtype=jnp.float32) * 0.5
    # quantum layer weights: (n_layers, n_qubits)
    qweights = jax.random.normal(k_w, (N_LAYERS, N_QUBITS), dtype=jnp.float32)

    # small batch (single grid step, TB == padded B)
    out = dressed_quantum_circuit(x, wpre, bpre, wpost, bpost, qweights)
    out = jax.block_until_ready(out)
    ref = reference_forward(np.asarray(x), np.asarray(wpre), np.asarray(bpre),
                            np.asarray(wpost), np.asarray(bpost), np.asarray(qweights))
    assert out.shape == (BATCH, 1)
    np.testing.assert_allclose(np.asarray(out), ref, rtol=1e-4, atol=1e-5)

    # larger batch exercising the multi-step grid (>= 2 steps) + batch padding path
    B2 = 600
    x2 = jax.random.normal(k_x2, (B2, IN_FEATURES), dtype=jnp.float32)
    out2 = dressed_quantum_circuit(x2, wpre, bpre, wpost, bpost, qweights)
    out2 = jax.block_until_ready(out2)
    ref2 = reference_forward(np.asarray(x2), np.asarray(wpre), np.asarray(bpre),
                             np.asarray(wpost), np.asarray(bpost), np.asarray(qweights))
    assert out2.shape == (B2, 1)
    np.testing.assert_allclose(np.asarray(out2), ref2, rtol=1e-4, atol=1e-5)

    # bf16 x / pre_net weight path (halves the dominant HBM read); looser tolerance expected
    out3 = dressed_quantum_circuit(x2, wpre, bpre, wpost, bpost, qweights,
                                   pre_dtype=jnp.bfloat16)
    out3 = jax.block_until_ready(out3)
    assert out3.shape == (B2, 1)
    np.testing.assert_allclose(np.asarray(out3), ref2, rtol=0.0, atol=5e-2)

    print("KERNEL_OK")
</pallas_src>

<mosaic_0001>
module attributes {stable_mosaic.version = 11 : i64} {
  func.func @dressed_qc_kernel(%arg0: i32, %arg1: memref<8x512xf32, #tpu.memory_space<vmem>>, %arg2: memref<512x4xf32, #tpu.memory_space<vmem>>, %arg3: memref<1x4xf32, #tpu.memory_space<vmem>>, %arg4: memref<16x16xf32, #tpu.memory_space<vmem>>, %arg5: memref<4x16xf32, #tpu.memory_space<vmem>>, %arg6: memref<1x16xf32, #tpu.memory_space<vmem>>, %arg7: memref<1x1xf32, #tpu.memory_space<vmem>>, %arg8: memref<8x1xf32, #tpu.memory_space<vmem>>) attributes {dimension_semantics = [#tpu.dimension_semantics<parallel>], iteration_bounds = array<i64: 1>, scalar_prefetch = 0 : i64, scratch_operands = 0 : i64, tpu.core_type = #tpu.core_type<tc>, window_params = [{transform_indices = @transform_0, window_bounds = array<i64: 8, 512>}, {pipeline_mode = #tpu.pipeline_mode<synchronous>, transform_indices = @transform_1, window_bounds = array<i64: 512, 4>}, {pipeline_mode = #tpu.pipeline_mode<synchronous>, transform_indices = @transform_2, window_bounds = array<i64: 1, 4>}, {pipeline_mode = #tpu.pipeline_mode<synchronous>, transform_indices = @transform_3, window_bounds = array<i64: 16, 16>}, {pipeline_mode = #tpu.pipeline_mode<synchronous>, transform_indices = @transform_4, window_bounds = array<i64: 4, 16>}, {pipeline_mode = #tpu.pipeline_mode<synchronous>, transform_indices = @transform_5, window_bounds = array<i64: 1, 16>}, {pipeline_mode = #tpu.pipeline_mode<synchronous>, transform_indices = @transform_6, window_bounds = array<i64: 1, 1>}, {transform_indices = @transform_7, window_bounds = array<i64: 8, 1>}]} {
    %c0 = arith.constant 0 : index
    %c0_0 = arith.constant 0 : index
    %0 = vector.load %arg1[%c0, %c0_0] : memref<8x512xf32, #tpu.memory_space<vmem>>, vector<8x512xf32>
    %c0_1 = arith.constant 0 : index
    %c0_2 = arith.constant 0 : index
    %1 = vector.load %arg2[%c0_1, %c0_2] : memref<512x4xf32, #tpu.memory_space<vmem>>, vector<512x4xf32>
    %cst = arith.constant dense<0.000000e+00> : vector<8x4xf32>
    %2 = tpu.matmul %0, %1, %cst {dimension_numbers = #tpu.dot_dimension_numbers<[1], [0], [0], [1], [0, 0, 1, 1], [], []>} : vector<8x512xf32>, vector<512x4xf32>, vector<8x4xf32> -> vector<8x4xf32>
    %c0_3 = arith.constant 0 : index
    %c0_4 = arith.constant 0 : index
    %3 = vector.load %arg3[%c0_3, %c0_4] : memref<1x4xf32, #tpu.memory_space<vmem>>, vector<1x4xf32>
    %4 = vector.broadcast %3 : vector<1x4xf32> to vector<8x4xf32>
    %5 = arith.addf %2, %4 : vector<8x4xf32>
    %6 = math.cos %5 : vector<8x4xf32>
    %7 = math.sin %5 : vector<8x4xf32>
    %8 = arith.subf %6, %7 : vector<8x4xf32>
    %9 = vector.extract_strided_slice %7 {offsets = [0, 0], sizes = [8, 1], strides = [1, 1]} : vector<8x4xf32> to vector<8x1xf32>
    %10 = vector.extract_strided_slice %8 {offsets = [0, 0], sizes = [8, 1], strides = [1, 1]} : vector<8x4xf32> to vector<8x1xf32>
    %c0_5 = arith.constant 0 : index
    %c0_6 = arith.constant 0 : index
    %11 = vector.load %arg5[%c0_5, %c0_6] : memref<4x16xf32, #tpu.memory_space<vmem>>, vector<1x16xf32>
    %12 = vector.broadcast %10 : vector<8x1xf32> to vector<8x16xf32>
    %13 = vector.broadcast %11 : vector<1x16xf32> to vector<8x16xf32>
    %14 = arith.mulf %12, %13 : vector<8x16xf32>
    %15 = vector.broadcast %9 : vector<8x1xf32> to vector<8x16xf32>
    %16 = arith.addf %15, %14 : vector<8x16xf32>
    %17 = vector.extract_strided_slice %7 {offsets = [0, 1], sizes = [8, 1], strides = [1, 1]} : vector<8x4xf32> to vector<8x1xf32>
    %18 = vector.extract_strided_slice %8 {offsets = [0, 1], sizes = [8, 1], strides = [1, 1]} : vector<8x4xf32> to vector<8x1xf32>
    %c1 = arith.constant 1 : index
    %c0_7 = arith.constant 0 : index
    %19 = vector.load %arg5[%c1, %c0_7] : memref<4x16xf32, #tpu.memory_space<vmem>>, vector<1x16xf32>
    %20 = vector.broadcast %18 : vector<8x1xf32> to vector<8x16xf32>
    %21 = vector.broadcast %19 : vector<1x16xf32> to vector<8x16xf32>
    %22 = arith.mulf %20, %21 : vector<8x16xf32>
    %23 = vector.broadcast %17 : vector<8x1xf32> to vector<8x16xf32>
    %24 = arith.addf %23, %22 : vector<8x16xf32>
    %25 = arith.mulf %16, %24 : vector<8x16xf32>
    %26 = vector.extract_strided_slice %7 {offsets = [0, 2], sizes = [8, 1], strides = [1, 1]} : vector<8x4xf32> to vector<8x1xf32>
    %27 = vector.extract_strided_slice %8 {offsets = [0, 2], sizes = [8, 1], strides = [1, 1]} : vector<8x4xf32> to vector<8x1xf32>
    %c2 = arith.constant 2 : index
    %c0_8 = arith.constant 0 : index
    %28 = vector.load %arg5[%c2, %c0_8] : memref<4x16xf32, #tpu.memory_space<vmem>>, vector<1x16xf32>
    %29 = vector.broadcast %27 : vector<8x1xf32> to vector<8x16xf32>
    %30 = vector.broadcast %28 : vector<1x16xf32> to vector<8x16xf32>
    %31 = arith.mulf %29, %30 : vector<8x16xf32>
    %32 = vector.broadcast %26 : vector<8x1xf32> to vector<8x16xf32>
    %33 = arith.addf %32, %31 : vector<8x16xf32>
    %34 = arith.mulf %25, %33 : vector<8x16xf32>
    %35 = vector.extract_strided_slice %7 {offsets = [0, 3], sizes = [8, 1], strides = [1, 1]} : vector<8x4xf32> to vector<8x1xf32>
    %36 = vector.extract_strided_slice %8 {offsets = [0, 3], sizes = [8, 1], strides = [1, 1]} : vector<8x4xf32> to vector<8x1xf32>
    %c3 = arith.constant 3 : index
    %c0_9 = arith.constant 0 : index
    %37 = vector.load %arg5[%c3, %c0_9] : memref<4x16xf32, #tpu.memory_space<vmem>>, vector<1x16xf32>
    %38 = vector.broadcast %36 : vector<8x1xf32> to vector<8x16xf32>
    %39 = vector.broadcast %37 : vector<1x16xf32> to vector<8x16xf32>
    %40 = arith.mulf %38, %39 : vector<8x16xf32>
    %41 = vector.broadcast %35 : vector<8x1xf32> to vector<8x16xf32>
    %42 = arith.addf %41, %40 : vector<8x16xf32>
    %43 = arith.mulf %34, %42 : vector<8x16xf32>
    %c0_10 = arith.constant 0 : index
    %c0_11 = arith.constant 0 : index
    %44 = vector.load %arg4[%c0_10, %c0_11] : memref<16x16xf32, #tpu.memory_space<vmem>>, vector<16x16xf32>
    %cst_12 = arith.constant dense<0.000000e+00> : vector<8x16xf32>
    %45 = tpu.matmul %43, %44, %cst_12 {dimension_numbers = #tpu.dot_dimension_numbers<[1], [0], [0], [1], [0, 0, 1, 1], [], []>} : vector<8x16xf32>, vector<16x16xf32>, vector<8x16xf32> -> vector<8x16xf32>
    %46 = arith.mulf %45, %45 : vector<8x16xf32>
    %c0_13 = arith.constant 0 : index
    %c0_14 = arith.constant 0 : index
    %47 = vector.load %arg6[%c0_13, %c0_14] : memref<1x16xf32, #tpu.memory_space<vmem>>, vector<1x16xf32>
    %48 = vector.broadcast %47 : vector<1x16xf32> to vector<8x16xf32>
    %49 = arith.mulf %46, %48 : vector<8x16xf32>
    %cst_15 = arith.constant dense<0.000000e+00> : vector<8xf32>
    %50 = vector.multi_reduction <add>, %49, %cst_15 [1] : vector<8x16xf32> to vector<8xf32>
    %51 = vector.shape_cast %50 : vector<8xf32> to vector<8x1xf32>
    %c0_16 = arith.constant 0 : index
    %c0_17 = arith.constant 0 : index
    %52 = vector.load %arg7[%c0_16, %c0_17] : memref<1x1xf32, #tpu.memory_space<vmem>>, vector<1x1xf32>
    %53 = vector.broadcast %52 : vector<1x1xf32> to vector<8x1xf32>
    %54 = arith.addf %51, %53 : vector<8x1xf32>
    %55 = arith.negf %54 : vector<8x1xf32>
    %56 = math.exp %55 : vector<8x1xf32>
    %cst_18 = arith.constant 1.000000e+00 : f32
    %57 = vector.broadcast %cst_18 : f32 to vector<8x1xf32>
    %58 = arith.addf %57, %56 : vector<8x1xf32>
    %59 = arith.divf %57, %58 : vector<8x1xf32>
    %c0_19 = arith.constant 0 : index
    %c0_20 = arith.constant 0 : index
    %60 = vector.load %arg8[%c0_19, %c0_20] : memref<8x1xf32, #tpu.memory_space<vmem>>, vector<8x1xf32>
    tpu.vector_store %arg8[%c0_19, %c0_20], %59 {strides = array<i32>} : memref<8x1xf32, #tpu.memory_space<vmem>>, vector<8x1xf32>,
    return
  }
  func.func @transform_0(%arg0: i32) -> (i32, i32) {
    %c0_i32 = arith.constant 0 : i32
    %c0_i32_0 = arith.constant 0 : i32
    return %arg0, %c0_i32 : i32, i32
  }
  func.func @transform_1(%arg0: i32) -> (i32, i32) {
    %c0_i32 = arith.constant 0 : i32
    %c0_i32_0 = arith.constant 0 : i32
    %c0_i32_1 = arith.constant 0 : i32
    return %c0_i32, %c0_i32_0 : i32, i32
  }
  func.func @transform_2(%arg0: i32) -> (i32, i32) {
    %c0_i32 = arith.constant 0 : i32
    %c0_i32_0 = arith.constant 0 : i32
    %c0_i32_1 = arith.constant 0 : i32
    return %c0_i32, %c0_i32_0 : i32, i32
  }
  func.func @transform_3(%arg0: i32) -> (i32, i32) {
    %c0_i32 = arith.constant 0 : i32
    %c0_i32_0 = arith.constant 0 : i32
    %c0_i32_1 = arith.constant 0 : i32
    return %c0_i32, %c0_i32_0 : i32, i32
  }
  func.func @transform_4(%arg0: i32) -> (i32, i32) {
    %c0_i32 = arith.constant 0 : i32
    %c0_i32_0 = arith.constant 0 : i32
    %c0_i32_1 = arith.constant 0 : i32
    return %c0_i32, %c0_i32_0 : i32, i32
  }
  func.func @transform_5(%arg0: i32) -> (i32, i32) {
    %c0_i32 = arith.constant 0 : i32
    %c0_i32_0 = arith.constant 0 : i32
    %c0_i32_1 = arith.constant 0 : i32
    return %c0_i32, %c0_i32_0 : i32, i32
  }
  func.func @transform_6(%arg0: i32) -> (i32, i32) {
    %c0_i32 = arith.constant 0 : i32
    %c0_i32_0 = arith.constant 0 : i32
    %c0_i32_1 = arith.constant 0 : i32
    return %c0_i32, %c0_i32_0 : i32, i32
  }
  func.func @transform_7(%arg0: i32) -> (i32, i32) {
    %c0_i32 = arith.constant 0 : i32
    %c0_i32_0 = arith.constant 0 : i32
    return %arg0, %c0_i32 : i32, i32
  }
}

</mosaic_0001>

<bundles_post_ra>
// kernel: tpu_custom_call.1
= control target key start
LH: loop header
LB: loop body
LE: loop exit
PB: predicated region body
PF: predicated region fallthrough
CT: control target
= control target key end

     0   :  { %s991_s1 = inlined_call_operand.vmem [shape: f32[512,4], index: 1, kind: input, shape index: {}]   ;;  %s992_s2 = inlined_call_operand.vmem [shape: f32[1,4], index: 2, kind: input, shape index: {}]   ;;  %s993_s0 = inlined_call_operand.vmem [shape: f32[8,512], index: 0, kind: input, shape index: {}]   ;;  %s994_s4 = inlined_call_operand.vmem [shape: f32[4,16], index: 4, kind: input, shape index: {}]   ;;  %s995_s5 = inlined_call_operand.vmem [shape: f32[1,16], index: 5, kind: input, shape index: {}]   ;;  %s996_s3 = inlined_call_operand.vmem [shape: f32[16,16], index: 3, kind: input, shape index: {}]   ;;  %s997_s6 = inlined_call_operand.<no memory space> [shape: f32[1,1], index: 6, kind: input, shape index: {}]   ;;  %s998_s7 = inlined_call_operand.vmem [shape: f32[8,1], index: 7, kind: output, shape index: {}]  }
   0x1   :  { %v79_v0 = vld [vmem:[%s991_s1 + $0x178] sm:$0xff]  ;;  %v78_v2 = vld [vmem:[%s991_s1 + $0x170] sm:$0xff]  ;;  %v77_v6 = vld [vmem:[%s991_s1 + $0x168] sm:$0xff] }
   0x2   :  { %v47_v1 = vld [vmem:[%s991_s1 + $0x78] sm:$0xff]  ;;  %140 = vmatpush.msra.mxu2 %v79_v0  ;;  %v46_v4 = vld [vmem:[%s991_s1 + $0x70] sm:$0xff]  ;;  %v45_v8 = vld [vmem:[%s991_s1 + $0x68] sm:$0xff] }
   0x3   :  { %100 = vmatpush.msra.mxu0 %v47_v1  ;;  %v95_v3 = vld [vmem:[%s991_s1 + $0x1f8] sm:$0xff]  ;;  %v94_v7 = vld [vmem:[%s991_s1 + $0x1f0] sm:$0xff]  ;;  %v93_v10 = vld [vmem:[%s991_s1 + $0x1e8] sm:$0xff] }
   0x4   :  { %v63_v5 = vld [vmem:[%s991_s1 + $0xf8] sm:$0xff]  ;;  %160 = vmatpush.msra.mxu3 %v95_v3  ;;  %141 = vmatpush.msra.mxu2 %v78_v2  ;;  %v62_v9 = vld [vmem:[%s991_s1 + $0xf0] sm:$0xff]  ;;  %v76_v11 = vld [vmem:[%s991_s1 + $0x160] sm:$0xff] }
   0x5   :  { %120 = vmatpush.msra.mxu1 %v63_v5  ;;  %101 = vmatpush.msra.mxu0 %v46_v4  ;;  %v44_v12 = vld [vmem:[%s991_s1 + $0x60] sm:$0xff]  ;;  %v61_v13 = vld [vmem:[%s991_s1 + $0xe8] sm:$0xff]  ;;  %v75_v16 = vld [vmem:[%s991_s1 + $0x158] sm:$0xff] }
   0x6   :  { %161 = vmatpush.msra.mxu3 %v94_v7  ;;  %142 = vmatpush.msra.mxu2 %v77_v6  ;;  %v92_v14 = vld [vmem:[%s991_s1 + $0x1e0] sm:$0xff]  ;;  %v43_v17 = vld [vmem:[%s991_s1 + $0x58] sm:$0xff]  ;;  %v74_v20 = vld [vmem:[%s991_s1 + $0x150] sm:$0xff]  ;;  %v645_v6 = vmov 2   ;;  %v646_v7 = vmov 0  }
   0x7   :  { %121 = vmatpush.msra.mxu1 %v62_v9  ;;  %102 = vmatpush.msra.mxu0 %v45_v8  ;;  %v60_v15 = vld [vmem:[%s991_s1 + $0xe0] sm:$0xff]  ;;  %v91_v18 = vld [vmem:[%s991_s1 + $0x1d8] sm:$0xff]  ;;  %v42_v21 = vld [vmem:[%s991_s1 + $0x50] sm:$0xff] }
   0x8   :  { %162 = vmatpush.msra.mxu3 %v93_v10  ;;  %143 = vmatpush.msra.mxu2 %v76_v11  ;;  %v59_v19 = vld [vmem:[%s991_s1 + $0xd8] sm:$0xff]  ;;  %v90_v22 = vld [vmem:[%s991_s1 + $0x1d0] sm:$0xff]  ;;  %v73_v24 = vld [vmem:[%s991_s1 + $0x148] sm:$0xff] }
   0x9   :  { %122 = vmatpush.msra.mxu1 %v61_v13  ;;  %103 = vmatpush.msra.mxu0 %v44_v12  ;;  %v58_v23 = vld [vmem:[%s991_s1 + $0xd0] sm:$0xff]  ;;  %v41_v25 = vld [vmem:[%s991_s1 + $0x48] sm:$0xff]  ;;  %v72_v28 = vld [vmem:[%s991_s1 + $0x140] sm:$0xff] }
   0xa   :  { %163 = vmatpush.msra.mxu3 %v92_v14  ;;  %144 = vmatpush.msra.mxu2 %v75_v16  ;;  %v89_v26 = vld [vmem:[%s991_s1 + $0x1c8] sm:$0xff]  ;;  %v40_v29 = vld [vmem:[%s991_s1 + $0x40] sm:$0xff]  ;;  %v71_v32 = vld [vmem:[%s991_s1 + $0x138] sm:$0xff] }
   0xb   :  { %123 = vmatpush.msra.mxu1 %v60_v15  ;;  %104 = vmatpush.msra.mxu0 %v43_v17  ;;  %v57_v27 = vld [vmem:[%s991_s1 + $0xc8] sm:$0xff]  ;;  %v88_v30 = vld [vmem:[%s991_s1 + $0x1c0] sm:$0xff]  ;;  %v39_v33 = vld [vmem:[%s991_s1 + $0x38] sm:$0xff] }
   0xc   :  { %164 = vmatpush.msra.mxu3 %v91_v18  ;;  %145 = vmatpush.msra.mxu2 %v74_v20  ;;  %v56_v31 = vld [vmem:[%s991_s1 + $0xc0] sm:$0xff]  ;;  %v87_v34 = vld [vmem:[%s991_s1 + $0x1b8] sm:$0xff]  ;;  %v70_v36 = vld [vmem:[%s991_s1 + $0x130] sm:$0xff] }
   0xd   :  { %124 = vmatpush.msra.mxu1 %v59_v19  ;;  %105 = vmatpush.msra.mxu0 %v42_v21  ;;  %v55_v35 = vld [vmem:[%s991_s1 + $0xb8] sm:$0xff]  ;;  %v38_v37 = vld [vmem:[%s991_s1 + $0x30] sm:$0xff]  ;;  %v69_v40 = vld [vmem:[%s991_s1 + $0x128] sm:$0xff] }
   0xe   :  { %165 = vmatpush.msra.mxu3 %v90_v22  ;;  %146 = vmatpush.msra.mxu2 %v73_v24  ;;  %v86_v38 = vld [vmem:[%s991_s1 + $0x1b0] sm:$0xff]  ;;  %v37_v41 = vld [vmem:[%s991_s1 + $0x28] sm:$0xff]  ;;  %v68_v44 = vld [vmem:[%s991_s1 + $0x120] sm:$0xff] }
   0xf   :  { %125 = vmatpush.msra.mxu1 %v58_v23  ;;  %106 = vmatpush.msra.mxu0 %v41_v25  ;;  %v54_v39 = vld [vmem:[%s991_s1 + $0xb0] sm:$0xff]  ;;  %v85_v42 = vld [vmem:[%s991_s1 + $0x1a8] sm:$0xff]  ;;  %v36_v45 = vld [vmem:[%s991_s1 + $0x20] sm:$0xff] }
  0x10   :  { %166 = vmatpush.msra.mxu3 %v89_v26  ;;  %147 = vmatpush.msra.mxu2 %v72_v28  ;;  %v53_v43 = vld [vmem:[%s991_s1 + $0xa8] sm:$0xff]  ;;  %v84_v46 = vld [vmem:[%s991_s1 + $0x1a0] sm:$0xff]  ;;  %v67_v48 = vld [vmem:[%s991_s1 + $0x118] sm:$0xff]  ;;  %v647_v26 = vmov 683565275  }
  0x11   :  { %126 = vmatpush.msra.mxu1 %v57_v27  ;;  %107 = vmatpush.msra.mxu0 %v40_v29  ;;  %v52_v47 = vld [vmem:[%s991_s1 + $0xa0] sm:$0xff]  ;;  %v35_v49 = vld [vmem:[%s991_s1 + $0x18] sm:$0xff]  ;;  %v66_v52 = vld [vmem:[%s991_s1 + $0x110] sm:$0xff]  ;;  %v648_v28 = vmov 2475754826  }
  0x12   :  { %167 = vmatpush.msra.mxu3 %v88_v30  ;;  %148 = vmatpush.msra.mxu2 %v71_v32  ;;  %v83_v50 = vld [vmem:[%s991_s1 + $0x198] sm:$0xff]  ;;  %v34_v53 = vld [vmem:[%s991_s1 + $0x10] sm:$0xff]  ;;  %v65_v56 = vld [vmem:[%s991_s1 + $0x108] sm:$0xff] }
  0x13   :  { %127 = vmatpush.msra.mxu1 %v56_v31  ;;  %108 = vmatpush.msra.mxu0 %v39_v33  ;;  %v51_v51 = vld [vmem:[%s991_s1 + $0x98] sm:$0xff]  ;;  %v82_v54 = vld [vmem:[%s991_s1 + $0x190] sm:$0xff]  ;;  %v33_v57 = vld [vmem:[%s991_s1 + $0x8] sm:$0xff]  ;;  %v649_v31 = vmov 2131351028  }
  0x14   :  { %168 = vmatpush.msra.mxu3 %v87_v34  ;;  %149 = vmatpush.msra.mxu2 %v70_v36  ;;  %v50_v55 = vld [vmem:[%s991_s1 + $0x90] sm:$0xff]  ;;  %v81_v58 = vld [vmem:[%s991_s1 + $0x188] sm:$0xff]  ;;  %v64_v60 = vld [vmem:[%s991_s1 + $0x100] sm:$0xff]  ;;  %v650_v34 = vmov 2102212464  }
  0x15   :  { %128 = vmatpush.msra.mxu1 %v55_v35  ;;  %109 = vmatpush.msra.mxu0 %v38_v37  ;;  %v49_v59 = vld [vmem:[%s991_s1 + $0x88] sm:$0xff]  ;;  %v32_v61 = vld [vmem:[%s991_s1] sm:$0xff]  ;;  %v30_v62 = vld [vmem:[%s993_s0 + $0x10] sm:$0xff]  ;;  %v651_v37 = vmov 920167782  }
  0x16   :  { %169 = vmatpush.msra.mxu3 %v86_v38  ;;  %150 = vmatpush.msra.mxu2 %v69_v40  ;;  %v80_v63 = vld [vmem:[%s991_s1 + $0x180] sm:$0xff]  ;;  %v31_v1 = vld [vmem:[%s993_s0 + $0x18] sm:$0xff]  ;;  %v29_v3 = vld [vmem:[%s993_s0 + $0x8] sm:$0xff]  ;;  %v652_v40 = vmov 1326507024  }
  0x17   :  { %129 = vmatpush.msra.mxu1 %v54_v39  ;;  %110 = vmatpush.msra.mxu0 %v37_v41  ;;  %v28_v0 = vld [vmem:[%s993_s0] sm:$0xff] }
  0x18   :  { %170 = vmatpush.msra.mxu3 %v85_v42  ;;  %151 = vmatpush.msra.mxu2 %v68_v44  ;;  %v48_v2 = vld [vmem:[%s991_s1 + $0x80] sm:$0xff] }
  0x19   :  { %130 = vmatpush.msra.mxu1 %v53_v43  ;;  %111 = vmatpush.msra.mxu0 %v36_v45  ;;  %v634_v4 = vld [vmem:[%s992_s2] ss:$0 sm:$0xff] }
  0x1a   :  { %171 = vmatpush.msra.mxu3 %v84_v46  ;;  %152 = vmatpush.msra.mxu2 %v67_v48 }
  0x1b   :  { %131 = vmatpush.msra.mxu1 %v52_v47  ;;  %112 = vmatpush.msra.mxu0 %v35_v49 }
  0x1c   :  { %172 = vmatpush.msra.mxu3 %v83_v50  ;;  %153 = vmatpush.msra.mxu2 %v66_v52 }
  0x1d   :  { %132 = vmatpush.msra.mxu1 %v51_v51  ;;  %113 = vmatpush.msra.mxu0 %v34_v53 }
  0x1e   :  { %173 = vmatpush.msra.mxu3 %v82_v54  ;;  %154 = vmatpush.msra.mxu2 %v65_v56 }
  0x1f   :  { %133 = vmatpush.msra.mxu1 %v50_v55  ;;  %114 = vmatpush.msra.mxu0 %v33_v57 }
  0x20   :  { %174 = vmatpush.msra.mxu3 %v81_v58  ;;  %155 = vmatpush.msra.mxu2 %v64_v60 }
  0x21   :  { %134 = vmatpush.msra.mxu1 %v49_v59  ;;  %115 = vmatpush.msra.mxu0 %v32_v61 }
  0x22   :  { %156 = vmatmul.f32.vlgmr.msra.gmra.mxu2 %v30_v62  ;;  %175 = vmatpush.msra.mxu3 %v80_v63 }
  0x23   :  { %116 = vmatmul.f32.vlgmr.msra.gmra.mxu0 %v28_v0  ;;  %176 = vmatmul.f32.vlgmr.msra.gmra.mxu3 %v31_v1 }
  0x24   :  { %135 = vmatpush.msra.mxu1 %v48_v2  ;;  %630 = vset.pattern.permute.xlu2 %v645_v6 }
  0x25   :  { %136 = vmatmul.f32.vlgmr.msra.gmra.mxu1 %v29_v3  ;;  %628 = vset.pattern.permute.xlu1 %v646_v7 }
  0x26   :  { %626 = vset.pattern.permute.xlu0 %v646_v7 }
  0xa0   :  { %v117_v5 = vpop.f32.mrf.mxu0 }
  0xa1   :  { %v118_v8 = vadd.f32 %v634_v4, %v117_v5 }
  0xa2   :  { %v137_v9 = vpop.f32.mrf.mxu1 }
  0xa3   :  { %v138_v10 = vadd.f32 %v137_v9, %v118_v8 }
  0xa5   :  { %v157_v11 = vpop.f32.mrf.mxu2 }
  0xa6   :  { %v158_v12 = vadd.f32 %v157_v11, %v138_v10  ;;  %v177_v13 = vpop.f32.mrf.mxu3 }
  0xa8   :  { %v904_v14 = vadd.f32 %v177_v13, %v158_v12 }
  0xaa   :  { %v183_v15 = vand.u32 2139095040, %v904_v14  ;;  %v180_v18 = vand.u32 2147483647, %v904_v14  ;;  %vm182_vm12 = vcmp.lt.s32.totalorder %v904_v14, 0 }
  0xac   :  { %v184_v16 = vshrl.u32 %v183_v15, 23  ;;  %v187_v20 = vand.u32 8388607, %v180_v18  ;;  %vm181_vm13 = vcmp.le.f32.partialorder %v180_v18, 0.7853982 }
  0xae   :  { %v608_v17 = vadd.s32 4294967169, %v184_v16  ;;  %v188_v24 = vor.u32 8388608, %v187_v20 }
  0xb0   :  { %v190_v19 = vadd.s32 1, %v608_v17  ;;  %v921_v47 = vshll.u32 %v188_v24, 8 }
  0xb2   :  { %vm191_vm0 = vcmp.gt.s32.totalorder %v190_v19, 0  ;;  %v229_v54 = vand.u32 65535, %v921_v47  ;;  %v230_v55 = vshrl.u32 %v921_v47, 16 }
  0xb3   :  { %v192_v21 = vsel %vm191_vm0, %v190_v19, 0 }
  0xb4   :  { %v194_v22 = vand.u32 31, %v192_v21  ;;  %v912_v25 = vshrl.u32 %v192_v21, 5 }
  0xb6   :  { %v910_v23 = vsub.s32 32, %v194_v22  ;;  %v197_v27 = vshll.u32 %v647_v26, %v194_v22  ;;  %v200_v29 = vshll.u32 %v648_v28, %v194_v22  ;;  %v203_v33 = vshll.u32 %v649_v31, %v194_v22 }
  0xb7   :  { %v206_v36 = vshll.u32 %v650_v34, %v194_v22  ;;  %v209_v39 = vshll.u32 %v651_v37, %v194_v22  ;;  %vm212_vm1 = vcmp.lt.s32.totalorder %v912_v25, 1  ;;  %vm215_vm2 = vcmp.lt.s32.totalorder %v912_v25, 4 }
  0xb8   :  { %v198_v30 = vshrl.u32 %v648_v28, %v910_v23  ;;  %v201_v32 = vshrl.u32 %v649_v31, %v910_v23  ;;  %v204_v35 = vshrl.u32 %v650_v34, %v910_v23  ;;  %v207_v38 = vshrl.u32 %v651_v37, %v910_v23 }
  0xb9   :  { %v210_v41 = vshrl.u32 %v652_v40, %v910_v23  ;;  %vm214_vm3 = vcmp.lt.s32.totalorder %v912_v25, 3  ;;  %vm213_vm4 = vcmp.lt.s32.totalorder %v912_v25, 2  ;;  %v196_v21 = vshrl.u32 %v647_v26, %v910_v23 }
  0xba   :  { %v199_v42 = vor.u32 %v198_v30, %v197_v27  ;;  %v202_v43 = vor.u32 %v201_v32, %v200_v29  ;;  %v205_v44 = vor.u32 %v204_v35, %v203_v33  ;;  %v208_v45 = vor.u32 %v207_v38, %v206_v36 }
  0xbb   :  { %v211_v46 = vor.u32 %v210_v41, %v209_v39 }
  0xbc   :  { %v220_v48 = vsel %vm212_vm1, %v199_v42, %v202_v43  ;;  %v224_v49 = vsel %vm212_vm1, %v202_v43, %v205_v44  ;;  %v221_v50 = vsel %vm215_vm2, %v208_v45, 920167782  ;;  %v217_v17 = vsel %vm215_vm2, %v205_v44, 2102212464 }
  0xbd   :  { %v225_v51 = vsel %vm215_vm2, %v211_v46, 1326507024  ;;  %v222_v52 = vsel %vm214_vm3, %v205_v44, %v221_v50  ;;  %v216_v30 = vsel %vm212_vm1, %v196_v21, %v199_v42  ;;  %v218_v31 = vsel %vm214_vm3, %v202_v43, %v217_v17 }
  0xbe   :  { %v226_v53 = vsel %vm214_vm3, %v208_v45, %v225_v51  ;;  %v223_v56 = vsel %vm213_vm4, %v220_v48, %v222_v52  ;;  %v219_v23 = vsel %vm213_vm4, %v216_v30, %v218_v31 }
  0xbf   :  { %v227_v57 = vsel %vm213_vm4, %v224_v49, %v226_v53  ;;  %v253_v60 = vand.u32 65535, %v223_v56  ;;  %v254_v61 = vshrl.u32 %v223_v56, 16  ;;  %v273_v38 = vmul.u32 %v921_v47, %v219_v23  ;;  %v543_v23 = vld [vmem:[%s996_s3] sm:$0xff] }
  0xc0   :  { %v231_v58 = vand.u32 65535, %v227_v57  ;;  %v232_v59 = vshrl.u32 %v227_v57, 16  ;;  %vm323_vm4 = vweird.f32 %v904_v14 }
  0xc1   :  { %v256_v0 = vmul.u32 %v254_v61, %v229_v54  ;;  %v257_v1 = vmul.u32 %v253_v60, %v230_v55  ;;  %v255_v5 = vmul.u32 %v253_v60, %v229_v54  ;;  %v258_v10 = vmul.u32 %v254_v61, %v230_v55 }
  0xc2   :  { %v234_v62 = vmul.u32 %v232_v59, %v229_v54  ;;  %v235_v63 = vmul.u32 %v231_v58, %v230_v55  ;;  %v233_v2 = vmul.u32 %v231_v58, %v229_v54  ;;  %v236_v4 = vmul.u32 %v232_v59, %v230_v55 }
  0xc3   :  { %v259_v6 = vshll.u32 %v256_v0, 16  ;;  %v261_v12 = vshll.u32 %v257_v1, 16  ;;  %v260_v28 = vshrl.u32 %v256_v0, 16  ;;  %v262_v34 = vshrl.u32 %v257_v1, 16 }
  0xc4   :  { %v237_v3 = vshll.u32 %v234_v62, 16  ;;  %v239_v8 = vshll.u32 %v235_v63, 16  ;;  %v238_v22 = vshrl.u32 %v234_v62, 16  ;;  %v240_v32 = vshrl.u32 %v235_v63, 16 }
  0xc5   :  { %vm263_vm6 = vc.u32 %v255_v5, %v259_v6  ;;  %v265_v13 = vadd.s32 %v259_v6, %v255_v5 }
  0xc6   :  { %vm241_vm5 = vc.u32 %v233_v2, %v237_v3  ;;  %v243_v9 = vadd.s32 %v237_v3, %v233_v2  ;;  %v264_v16 = vsel %vm263_vm6, 1, %v646_v7 }
  0xc7   :  { %v242_v11 = vsel %vm241_vm5, 1, %v646_v7  ;;  %v266_v20 = vadd.s32 %v264_v16, %v258_v10  ;;  %vm267_vm8 = vc.u32 %v265_v13, %v261_v12  ;;  %v269_v37 = vadd.s32 %v265_v13, %v261_v12 }
  0xc8   :  { %v244_v15 = vadd.s32 %v242_v11, %v236_v4  ;;  %vm245_vm7 = vc.u32 %v243_v9, %v239_v8  ;;  %v268_v27 = vsel %vm267_vm8, 1, %v646_v7  ;;  %vm545_vm5 = vcmask 130048  }
  0xc9   :  { %v246_v19 = vsel %vm245_vm7, 1, %v646_v7  ;;  %v270_v29 = vadd.s32 %v268_v27, %v266_v20  ;;  %vm602_vm8 = vcmask 7168  }
  0xca   :  { %v248_v24 = vadd.s32 %v246_v19, %v244_v15 }
  0xcb   :  { %v271_v35 = vadd.s32 %v270_v29, %v260_v28 }
  0xcc   :  { %v249_v33 = vadd.s32 %v248_v24, %v238_v22 }
  0xcd   :  { %v272_v26 = vadd.s32 %v271_v35, %v262_v34 }
  0xce   :  { %v250_v36 = vadd.s32 %v249_v33, %v240_v32 }
  0xcf   :  { %v276_v7 = vadd.s32 1, %v272_v26 }
  0xd0   :  { %vm275_vm9 = vc.u32 %v250_v36, %v269_v37  ;;  %v274_v25 = vadd.s32 %v269_v37, %v250_v36  ;;  %v653_v36 = vmov 1   ;;  %v654_v37 = vmov 3  }
  0xd1   :  { %v277_v39 = vsel %vm275_vm9, %v276_v7, %v272_v26 }
  0xd2   :  { %v278_v40 = vadd.s32 %v277_v39, %v273_v38  ;;  %v636_v39 = vld [vmem:[%s994_s4] ss:$0 sm:$0xff] }
  0xd4   :  { %v279_v41 = vadd.s32 536870912, %v278_v40 }
  0xd6   :  { %v280_v42 = vshrl.u32 %v279_v41, 30 }
  0xd8   :  { %v281_v44 = vshll.u32 %v280_v42, 30  ;;  %v304_v63 = vsub.s32 4, %v280_v42 }
  0xda   :  { %v282_v43 = vsub.s32 %v278_v40, %v281_v44  ;;  %v305_v4 = vsel %vm182_vm12, %v304_v63, %v280_v42  ;;  %v637_v40 = vld [vmem:[%s994_s4 + $0x1] ss:$0 sm:$0xff]  ;;  %v635_v44 = vld [vmem:[%s994_s4 + $0x2] ss:$0 sm:$0xff] }
  0xdb   :  { %v307_v8 = vsel %vm181_vm13, 0, %v305_v4 }
  0xdc   :  { %vm283_vm10 = vcmp.lt.s32.totalorder %v282_v43, 0  ;;  %v284_v45 = vsub.s32 0, %v282_v43  ;;  %v478_v13 = vadd.s32 3, %v307_v8  ;;  %v324_v19 = vand.u32 3, %v307_v8 }
  0xde   :  { %v285_v46 = vsel %vm283_vm10, %v284_v45, %v282_v43  ;;  %v479_v20 = vand.u32 3, %v478_v13  ;;  %vm325_vm14 = vcmp.lt.s32.totalorder %v324_v19, 2  ;;  %vm326_vm15 = vcmp.eq.s32.totalorder %v324_v19, 0 }
  0xdf   :  { %v286_v48 = vclz %v285_v46  ;;  %vm329_vm0 = vcmp.eq.s32.totalorder %v324_v19, 2 }
  0xe0   :  { %vm480_vm1 = vcmp.lt.s32.totalorder %v479_v20, 2  ;;  %vm481_vm2 = vcmp.eq.s32.totalorder %v479_v20, 0  ;;  %vm484_vm3 = vcmp.eq.s32.totalorder %v479_v20, 2 }
  0xe1   :  { %v609_v49 = vadd.s32 4294967294, %v286_v48 }
  0xe3   :  { %vm610_vm11 = vcmp.lt.s32.totalorder %v609_v49, 0 }
  0xe4   :  { %v289_v50 = vsel %vm610_vm11, 0, %v609_v49 }
  0xe5   :  { %v290_v51 = vsub.s32 32, %v289_v50  ;;  %v294_v52 = vsub.s32 4294967266, %v289_v50  ;;  %v291_v53 = vshll.u32 %v282_v43, %v289_v50 }
  0xe7   :  { %v292_v54 = vshrl.u32 %v274_v25, %v290_v51  ;;  %v295_v55 = vadd.s32 127, %v294_v52  ;;  %v638_v25 = vld [vmem:[%s994_s4 + $0x3] ss:$0 sm:$0xff] }
  0xe9   :  { %v293_v47 = vor.u32 %v292_v54, %v291_v53  ;;  %v296_v56 = vshll.u32 %v295_v55, 23 }
  0xeb   :  { %v297_v57 = vor.u32 4788187, %v296_v56  ;;  %v300_v59 = vcvt.s32.f32 %v293_v47 }
  0xed   :  { %v298_v58 = vand.u32 2147483647, %v297_v57 }
  0xef   :  { %v301_v60 = vmul.f32 %v300_v59, %v298_v58  ;;  %v12_v58 = vstv %s997_s6  ;;  %v639_v59 = vld [vmem:[%s995_s5] ss:$0 sm:$0xff] }
  0xf0   :  { %13 = vst [vmem:[#allocation2] sm:$0x1] %v12_v58 }
  0xf1   :  { %v302_v61 = vxor.u32 2147483648, %v301_v60 }
  0xf3   :  { %v303_v62 = vsel %vm182_vm12, %v302_v61, %v301_v60 }
  0xf4   :  { %v306_v0 = vsel %vm181_vm13, %v904_v14, %v303_v62  ;;  %v544_v14 = vld [vmem:[%s996_s3 + $0x8] sm:$0xff] }
  0xf5   :  { %v308_v1 = vmul.f32 %v306_v0, %v306_v0  ;;  %563 = vmatpush.msrb.mxu0 %v544_v14 }
  0xf7   :  { %v309_v2 = vmul.f32 -0.001358992, %v308_v1  ;;  %v316_v3 = vmul.f32 -0.00019511016, %v308_v1  ;;  %564 = vmatpush.msrb.mxu0 %v543_v23 }
  0xf9   :  { %v310_v5 = vadd.f32 0.041655596, %v309_v2  ;;  %v317_v6 = vadd.f32 0.008332121, %v316_v3 }
  0xfb   :  { %v311_v9 = vmul.f32 %v310_v5, %v308_v1  ;;  %v318_v10 = vmul.f32 %v317_v6, %v308_v1 }
  0xfd   :  { %v312_v11 = vadd.f32 -0.4999988, %v311_v9  ;;  %v319_v12 = vadd.f32 -0.16666654, %v318_v10 }
  0xff   :  { %v313_v15 = vmul.f32 %v312_v11, %v308_v1  ;;  %v320_v16 = vmul.f32 %v319_v12, %v308_v1 }
 0x101   :  { %v314_v17 = vadd.f32 1.0, %v313_v15  ;;  %v321_v18 = vadd.f32 1.0, %v320_v16 }
 0x103   :  { %v322_v21 = vmul.f32 %v321_v18, %v306_v0  ;;  %v330_v22 = vxor.u32 2147483648, %v314_v17  ;;  %v640_v0 = vld [vmem:[#allocation2] ss:$0 sm:$0xff] }
 0x105   :  { %v327_v24 = vxor.u32 2147483648, %v322_v21  ;;  %v486_v28 = vsel %vm484_vm3, %v330_v22, %v322_v21  ;;  %v331_v30 = vsel %vm329_vm0, %v330_v22, %v322_v21 }
 0x107   :  { %v483_v27 = vsel %vm481_vm2, %v314_v17, %v327_v24  ;;  %v328_v29 = vsel %vm326_vm15, %v314_v17, %v327_v24 }
 0x108   :  { %v487_v31 = vsel %vm480_vm1, %v483_v27, %v486_v28  ;;  %v332_v32 = vsel %vm325_vm14, %v328_v29, %v331_v30 }
 0x109   :  { %v488_v33 = vsel %vm323_vm4, nan, %v487_v31  ;;  %v333_v34 = vsel %vm323_vm4, nan, %v332_v32 }
 0x10a   :  { %525 = vperm.xlu2 %630, %v488_v33   ;;  %500 = vperm.xlu1 %628, %v488_v33   ;;  %v489_v35 = vsub.f32 %v333_v34, %v488_v33 }
 0x10c   :  { %493 = vperm.xlu0 %626, %v489_v35  }
 0x112   :  { %629 = vset.pattern.permute.xlu1 %v653_v36  ;;  %519 = vperm.xlu2 %630, %v489_v35  }
 0x113   :  { %512 = vperm.xlu1 %629, %v488_v33  }
 0x114   :  { %627 = vset.pattern.permute.xlu0 %v653_v36 }
 0x115   :  { %506 = vperm.xlu0 %627, %v489_v35  }
 0x11a   :  { %632 = vset.pattern.permute.xlu2 %v654_v37 }
 0x11b   :  { %631 = vset.pattern.permute.xlu1 %v654_v37  ;;  %538 = vperm.xlu2 %632, %v488_v33  }
 0x11c   :  { %532 = vperm.xlu1 %631, %v489_v35  }
 0x11d   :  { %633 = vset.pattern.permute.xlu0 %v654_v37 }
 0x164   :  { %v526_v26 = vpop.permute.xlu2 %525 }
 0x16c   :  { %v520_v42 = vpop.permute.xlu2 %519 }
 0x16d   :  { %v523_v49 = vmul.f32 %v635_v44, %v520_v42 }
 0x16f   :  { %v528_v53 = vadd.f32 %v526_v26, %v523_v49 }
 0x175   :  { %v539_v55 = vpop.permute.xlu2 %538 }
 0x17c   :  { %v501_v7 = vpop.permute.xlu1 %500 }
 0x17e   :  { %v494_v38 = vpop.permute.xlu0 %493 }
 0x17f   :  { %v497_v43 = vmul.f32 %v636_v39, %v494_v38 }
 0x181   :  { %v503_v50 = vadd.f32 %v501_v7, %v497_v43 }
 0x185   :  { %v513_v41 = vpop.permute.xlu1 %512 }
 0x187   :  { %v507_v45 = vpop.permute.xlu0 %506 }
 0x188   :  { %v510_v46 = vmul.f32 %v637_v40, %v507_v45 }
 0x18a   :  { %v515_v48 = vadd.f32 %v513_v41, %v510_v46 }
 0x18c   :  { %v516_v51 = vmul.f32 %v515_v48, %v503_v50 }
 0x18e   :  { %v533_v52 = vpop.permute.xlu1 %532  ;;  %v529_v47 = vmul.f32 %v528_v53, %v516_v51 }
 0x18f   :  { %v536_v54 = vmul.f32 %v638_v25, %v533_v52 }
 0x191   :  { %v541_v56 = vadd.f32 %v539_v55, %v536_v54 }
 0x193   :  { %v542_v57 = vmul.f32 %v541_v56, %v529_v47 }
 0x195   :  { %614 = vmatmul.msk.f32.vlgmr.msrb.gmra.mxu0 %vm545_vm5, %v542_v57 }
 0x212   :  { %v566_v60 = vpop.f32.mrf.mxu0 }
 0x213   :  { %v569_v61 = vmul.f32 %v566_v60, %v566_v60 }
 0x215   :  { %v574_v62 = vmul.f32 %v639_v59, %v569_v61 }
 0x217   :  { %v575_v63 = vsel %vm545_vm5, %v574_v62, 0.0 }
 0x218   :  { %576 = vadd.xlane.f32.xlu0 %v575_v63 }
 0x28b   :  { %v577_v1 = vpop.xlane.xlu0 %576 }
 0x28c   :  { %v582_v2 = vadd.f32 %v640_v0, %v577_v1 }
 0x28e   :  { %v615_v3 = vmul.f32 -1.442695, %v582_v2 }
 0x290   :  { %641 = vpow2.f32 %v615_v3 }
 0x296   :  { %v642_v4 = vpop.eup %641 }
 0x297   :  { %v586_v5 = vadd.f32 1.0, %v642_v4 }
 0x299   :  { %643 = vrcp.f32 %v586_v5  ;;  %v598_v10 = vand.u32 2147483648, %v586_v5  ;;  %v596_v12 = vand.u32 2147483647, %v586_v5  ;;  %vm592_vm7 = vweird.f32 %v586_v5 }
 0x29b   :  { %v599_v15 = vor.u32 1.1754944e-38, %v598_v10  ;;  %vm597_vm10 = vcmp.eq.f32.partialorder %v596_v12, 8.507059e+37 }
 0x29f   :  { %v644_v6 = vpop.eup %643 }
 0x2a0   :  { %v588_v8 = vmul.f32 %v644_v6, %v586_v5  ;;  %vm593_vm6 = vweird.f32 %v644_v6 }
 0x2a1   :  { %vm594_vm9 = vmor %vm592_vm7, %vm593_vm6 }
 0x2a2   :  { %v589_v9 = vsub.f32 1.0, %v588_v8 }
 0x2a4   :  { %v590_v11 = vmul.f32 %v644_v6, %v589_v9 }
 0x2a6   :  { %v591_v13 = vadd.f32 %v644_v6, %v590_v11 }
 0x2a8   :  { %v595_v16 = vsel %vm594_vm9, %v644_v6, %v591_v13 }
 0x2a9   :  { %v600_v17 = vsel %vm597_vm10, %v599_v15, %v595_v16 }
 0x2aa   :  { %603 = vst.msk [vmem:[%s998_s7] sm:$0xff] %vm602_vm8, %v600_v17 }

</bundles_post_ra>
